<compile_context>
chip_gen: v7x
topology: tpu7x:2x2x1
jax: 0.10.0
libtpu: 0.0.40
codegen_flags: <defaults>
</compile_context>

<pallas_src>
import jax
import jax.numpy as jnp
from jax.experimental import pallas as pl
from jax.experimental.pallas import tpu as pltpu

# ---- static problem sizes implied by the module (Linear(384, ...) => L=16) ----
B = 4            # batch
L = 16           # input sequence length
K = 3            # conv kernel size
C1, L1 = 16, L - 2       # after Conv1d(1, 16, 3)   -> (16, 14)
C2, L2 = 32, L1 - 2      # after Conv1d(16, 32, 3)  -> (32, 12)
D1 = C1 * L1             # 224
F = C2 * L2              # 384  (PyTorch Flatten width)
H1, H2, H3 = 100, 50, 25
EPS = 1e-5

# ---- lane/sublane padded sizes (full vregs everywhere) ------------------------
BP = 8            # batch 4 -> 8 sublanes
D1P = 256         # 224 -> 256 lanes
H1P = 128         # 100 -> 128
H2P = 128         # 50  -> 128
H3P = 128         # 25  -> 128
OUTP = 128        # 1   -> 128 (sliced to [:, :1] in the wrapper)

# bf16 weights halve the exposed HBM->VMEM weight DMA (the dominant cost on
# v5e/v6e for this overhead-bound kernel).  Set to jnp.float32 for a strict
# 1e-5 match against the f32 reference.
WEIGHT_DTYPE = jnp.bfloat16


# ============================== fused kernel ==================================
# No grid: all rows processed in one program; everything resident in VMEM.
def _fused_kernel(x_ref, w1_ref, w2_ref, w3_ref, wpk_ref, sh_ref, o_ref):
    # Dropout(0.5) layers are identity in inference mode.
    # TODO(synk): training-mode dropout (RNG masking) intentionally not modeled.
    def dot(a, w):
        return jnp.dot(a.astype(w.dtype), w, preferred_element_type=jnp.float32)

    def layer(h, w, row, width):
        # BN scale is pre-folded into w's columns; shift row is a (1, width) view.
        return jnp.maximum(dot(h, w) + sh_ref[row:row + 1, :width], 0.0)

    h = layer(x_ref[...], w1_ref[...], 0, D1P)           # Conv1d(1,16,3)+BN+ReLU  -> (8,256)
    h = layer(h, w2_ref[...], 1, F)                      # Conv1d(16,32,3)+BN+ReLU -> (8,384) == Flatten order
    h = layer(h, w3_ref[...], 2, H1P)                    # Linear(384,100)+BN+ReLU -> (8,128)
    h = layer(h, wpk_ref[0:H1P, :], 3, H2P)              # Linear(100,50)+BN+ReLU
    h = layer(h, wpk_ref[H1P:H1P + H2P, :], 4, H3P)      # Linear(50,25)+BN+ReLU
    z = dot(h, wpk_ref[H1P + H2P:H1P + H2P + H3P, :]) + sh_ref[5:6, :OUTP]   # Linear(25,1)
    o_ref[...] = jax.nn.sigmoid(z)                       # (8,128), col 0 is the real output


# ====================== one-time parameter preparation ========================
def _fold_bn(bn):
    gamma, beta, mean, var = bn
    scale = gamma / jnp.sqrt(var + EPS)
    shift = beta - mean * scale
    return scale, shift


def _conv1_toeplitz(w1):
    # W[l, c1*L1 + tau] = w1[c1, l - tau] if 0 <= l - tau < K else 0
    l_i = jnp.arange(L).reshape(L, 1, 1)
    t_i = jnp.arange(L1).reshape(1, 1, L1)
    w = jnp.zeros((L, C1, L1), jnp.float32)
    for k in range(K):
        mask = (l_i == t_i + k)                               # (L, 1, L1)
        w = jnp.where(mask, w1[:, k].reshape(1, C1, 1), w)
    return w.reshape(L, D1)                                   # (16, 224)


def _conv2_toeplitz(w2):
    # W[c1*L1 + tau, c2*L2 + t] = w2[c2, c1, tau - t] if 0 <= tau - t < K else 0
    a_i = jnp.arange(L1).reshape(1, L1, 1, 1)
    t_i = jnp.arange(L2).reshape(1, 1, 1, L2)
    w = jnp.zeros((C1, L1, C2, L2), jnp.float32)
    for k in range(K):
        mask = (a_i == t_i + k)                               # (1, L1, 1, L2)
        wk = jnp.transpose(w2[:, :, k]).reshape(C1, 1, C2, 1) # (C1,1,C2,1)
        w = jnp.where(mask, wk, w)
    return w.reshape(D1, F)                                   # (224, 384)


def _pad2(a, rows, cols):
    return jnp.zeros((rows, cols), jnp.float32).at[:a.shape[0], :a.shape[1]].set(a)


def _pad_row(v, cols):
    return jnp.zeros((cols,), jnp.float32).at[:v.shape[0]].set(v)


def prepare_params(P):
    """Kernel-ready layouts; call ONCE (outside the jitted per-call path)."""
    s1, t1 = _fold_bn(P["bn1"])
    s2, t2 = _fold_bn(P["bn2"])
    s3, t3 = _fold_bn(P["bn3"])
    s4, t4 = _fold_bn(P["bn4"])
    s5, t5 = _fold_bn(P["bn5"])

    # conv1: Toeplitz + BN1 scale folded into columns (col order c1*L1+tau), lane-padded.
    w1 = _conv1_toeplitz(P["w_conv1"]) * jnp.repeat(s1, L1)[None, :]
    w1 = _pad2(w1, L, D1P)                                           # (16, 256)
    sh1 = _pad_row(jnp.repeat(s1 * P["b_conv1"] + t1, L1), F)        # conv1 bias folded

    # conv2: Toeplitz + BN2 scale folded (col order c2*L2+t == PyTorch Flatten order).
    w2 = _conv2_toeplitz(P["w_conv2"]) * jnp.repeat(s2, L2)[None, :]
    w2 = _pad2(w2, D1P, F)                                           # (256, 384)
    sh2 = _pad_row(jnp.repeat(s2 * P["b_conv2"] + t2, L2), F)

    # FC layers: transpose, fold BN scale into columns, zero-pad to full tiles.
    w3 = _pad2(P["w_fc1"].T * s3[None, :], F, H1P)                   # (384, 128)
    sh3 = _pad_row(s3 * P["b_fc1"] + t3, F)
    w4 = _pad2(P["w_fc2"].T * s4[None, :], H1P, H2P)                 # (128, 128)
    sh4 = _pad_row(s4 * P["b_fc2"] + t4, F)
    w5 = _pad2(P["w_fc3"].T * s5[None, :], H2P, H3P)                 # (128, 128)
    sh5 = _pad_row(s5 * P["b_fc3"] + t5, F)
    w6 = _pad2(P["w_fc4"].T, H3P, OUTP)                              # (128, 128), no BN
    sh6 = _pad_row(P["b_fc4"], F)

    wpack = jnp.concatenate([w4, w5, w6], axis=0)                    # (384, 128)
    zero = jnp.zeros((F,), jnp.float32)
    shifts = jnp.stack([sh1, sh2, sh3, sh4, sh5, sh6, zero, zero])   # (8, 384)

    wd = WEIGHT_DTYPE
    return (w1.astype(wd), w2.astype(wd), w3.astype(wd), wpack.astype(wd),
            shifts.astype(jnp.float32))


# ================================ forward =====================================
def cnn_mlp_forward(x, kernel_params):
    b = x.shape[0]
    assert b <= BP
    # Sublane-pad the batch to 8 rows (zeros); kernel output sliced back below.
    xp = jnp.zeros((BP, L), jnp.float32).at[:b, :].set(x.astype(jnp.float32))

    vmem = pl.BlockSpec(memory_space=pltpu.MemorySpace.VMEM)
    n_in = 1 + len(kernel_params)

    dims = [(L, D1P), (D1P, F), (F, H1P), (H1P, H2P), (H2P, H3P), (H3P, OUTP)]
    flops = 2 * BP * sum(m * n for m, n in dims)
    bytes_accessed = int(xp.size) * 4 + BP * OUTP * 4
    bytes_accessed += sum(int(p.size) * p.dtype.itemsize for p in kernel_params)
    ce = pl.CostEstimate(flops=flops, transcendentals=BP * OUTP,
                         bytes_accessed=bytes_accessed)

    out = pl.pallas_call(
        _fused_kernel,
        out_shape=jax.ShapeDtypeStruct((BP, OUTP), jnp.float32),
        in_specs=[vmem] * n_in,
        out_specs=vmem,
        cost_estimate=ce,
    )(xp, *kernel_params)
    return out[:b, :1]


# ============================ pure-JAX reference ==============================
def ref_forward(x, P):
    def bn_ncw(h, bn):
        g, b_, m, v = bn
        return (h - m[None, :, None]) * (g / jnp.sqrt(v + EPS))[None, :, None] + b_[None, :, None]

    def bn_nf(h, bn):
        g, b_, m, v = bn
        return (h - m) * (g / jnp.sqrt(v + EPS)) + b_

    h = x[:, None, :]
    h = jax.lax.conv_general_dilated(h, P["w_conv1"][:, None, :], (1,), "VALID",
                                     dimension_numbers=("NCH", "OIH", "NCH"))
    h = h + P["b_conv1"][None, :, None]
    h = jnp.maximum(bn_ncw(h, P["bn1"]), 0.0)
    h = jax.lax.conv_general_dilated(h, P["w_conv2"], (1,), "VALID",
                                     dimension_numbers=("NCH", "OIH", "NCH"))
    h = h + P["b_conv2"][None, :, None]
    h = jnp.maximum(bn_ncw(h, P["bn2"]), 0.0)
    h = h.reshape(x.shape[0], -1)                       # the `reshape` module
    h = jnp.maximum(bn_nf(h @ P["w_fc1"].T + P["b_fc1"], P["bn3"]), 0.0)
    h = jnp.maximum(bn_nf(h @ P["w_fc2"].T + P["b_fc2"], P["bn4"]), 0.0)
    h = jnp.maximum(bn_nf(h @ P["w_fc3"].T + P["b_fc3"], P["bn5"]), 0.0)
    return jax.nn.sigmoid(h @ P["w_fc4"].T + P["b_fc4"])


# =============================== params init ==================================
def init_params(key):
    ks = iter(jax.random.split(key, 40))
    rnd = lambda shape, scale=0.1: scale * jax.random.normal(next(ks), shape, jnp.float32)

    def bn(n):
        gamma = 1.0 + rnd((n,))
        beta = rnd((n,))
        running_mean = rnd((n,))
        running_var = 1.0 + jnp.abs(rnd((n,)))
        return (gamma, beta, running_mean, running_var)

    return {
        "w_conv1": rnd((C1, K)),          # Conv1d(1,16,3).weight squeezed over in-ch
        "b_conv1": rnd((C1,)),
        "bn1": bn(C1),
        "w_conv2": rnd((C2, C1, K)),      # Conv1d(16,32,3).weight
        "b_conv2": rnd((C2,)),
        "bn2": bn(C2),
        "w_fc1": rnd((H1, F)), "b_fc1": rnd((H1,)), "bn3": bn(H1),
        "w_fc2": rnd((H2, H1)), "b_fc2": rnd((H2,)), "bn4": bn(H2),
        "w_fc3": rnd((H3, H2)), "b_fc3": rnd((H3,)), "bn5": bn(H3),
        "w_fc4": rnd((1, H3)), "b_fc4": rnd((1,)),
    }


if __name__ == "__main__":
    key = jax.random.PRNGKey(0)
    kx, kp = jax.random.split(key)
    x = jax.random.normal(kx, (B, L), jnp.float32)
    params = init_params(kp)

    # One-time, hoisted weight preprocessing (Toeplitz expansion + BN folding + padding).
    kernel_params = prepare_params(params)

    fwd = jax.jit(cnn_mlp_forward)
    out = jax.block_until_ready(fwd(x, kernel_params))

    ref = ref_forward(x, params)
    tol = 1e-5 if WEIGHT_DTYPE == jnp.float32 else 2e-2   # bf16 weight quantization
    assert out.shape == (B, 1), out.shape
    assert jnp.allclose(out, ref, atol=tol, rtol=tol), (out, ref)
    print("KERNEL_OK")
</pallas_src>

<mosaic_0001>
module attributes {stable_mosaic.version = 11 : i64} {
  func.func @_fused_kernel(%arg0: memref<8x16xf32, #tpu.memory_space<vmem>>, %arg1: memref<16x256xbf16, #tpu.memory_space<vmem>>, %arg2: memref<256x384xbf16, #tpu.memory_space<vmem>>, %arg3: memref<384x128xbf16, #tpu.memory_space<vmem>>, %arg4: memref<384x128xbf16, #tpu.memory_space<vmem>>, %arg5: memref<8x384xf32, #tpu.memory_space<vmem>>, %arg6: memref<8x128xf32, #tpu.memory_space<vmem>>) attributes {dimension_semantics = [], scalar_prefetch = 0 : i64, scratch_operands = 0 : i64, tpu.core_type = #tpu.core_type<tc>} {
    %c0 = arith.constant 0 : index
    %c0_0 = arith.constant 0 : index
    %0 = vector.load %arg0[%c0, %c0_0] : memref<8x16xf32, #tpu.memory_space<vmem>>, vector<8x16xf32>
    %c0_1 = arith.constant 0 : index
    %c0_2 = arith.constant 0 : index
    %1 = vector.load %arg1[%c0_1, %c0_2] : memref<16x256xbf16, #tpu.memory_space<vmem>>, vector<16x256xbf16>
    %2 = arith.truncf %0 : vector<8x16xf32> to vector<8x16xbf16>
    %cst = arith.constant dense<0.000000e+00> : vector<8x256xf32>
    %3 = tpu.matmul %2, %1, %cst {dimension_numbers = #tpu.dot_dimension_numbers<[1], [0], [0], [1], [0, 0, 1, 1], [], []>} : vector<8x16xbf16>, vector<16x256xbf16>, vector<8x256xf32> -> vector<8x256xf32>
    %c0_3 = arith.constant 0 : index
    %c0_4 = arith.constant 0 : index
    %4 = vector.load %arg5[%c0_3, %c0_4] : memref<8x384xf32, #tpu.memory_space<vmem>>, vector<1x256xf32>
    %5 = vector.broadcast %4 : vector<1x256xf32> to vector<8x256xf32>
    %6 = arith.addf %3, %5 : vector<8x256xf32>
    %cst_5 = arith.constant 0.000000e+00 : f32
    %7 = vector.broadcast %cst_5 : f32 to vector<8x256xf32>
    %8 = arith.maximumf %6, %7 : vector<8x256xf32>
    %c0_6 = arith.constant 0 : index
    %c0_7 = arith.constant 0 : index
    %9 = vector.load %arg2[%c0_6, %c0_7] : memref<256x384xbf16, #tpu.memory_space<vmem>>, vector<256x384xbf16>
    %10 = arith.truncf %8 : vector<8x256xf32> to vector<8x256xbf16>
    %cst_8 = arith.constant dense<0.000000e+00> : vector<8x384xf32>
    %11 = tpu.matmul %10, %9, %cst_8 {dimension_numbers = #tpu.dot_dimension_numbers<[1], [0], [0], [1], [0, 0, 1, 1], [], []>} : vector<8x256xbf16>, vector<256x384xbf16>, vector<8x384xf32> -> vector<8x384xf32>
    %c1 = arith.constant 1 : index
    %c0_9 = arith.constant 0 : index
    %12 = vector.load %arg5[%c1, %c0_9] : memref<8x384xf32, #tpu.memory_space<vmem>>, vector<1x384xf32>
    %13 = vector.broadcast %12 : vector<1x384xf32> to vector<8x384xf32>
    %14 = arith.addf %11, %13 : vector<8x384xf32>
    %cst_10 = arith.constant 0.000000e+00 : f32
    %15 = vector.broadcast %cst_10 : f32 to vector<8x384xf32>
    %16 = arith.maximumf %14, %15 : vector<8x384xf32>
    %c0_11 = arith.constant 0 : index
    %c0_12 = arith.constant 0 : index
    %17 = vector.load %arg3[%c0_11, %c0_12] : memref<384x128xbf16, #tpu.memory_space<vmem>>, vector<384x128xbf16>
    %18 = arith.truncf %16 : vector<8x384xf32> to vector<8x384xbf16>
    %cst_13 = arith.constant dense<0.000000e+00> : vector<8x128xf32>
    %19 = tpu.matmul %18, %17, %cst_13 {dimension_numbers = #tpu.dot_dimension_numbers<[1], [0], [0], [1], [0, 0, 1, 1], [], []>} : vector<8x384xbf16>, vector<384x128xbf16>, vector<8x128xf32> -> vector<8x128xf32>
    %c2 = arith.constant 2 : index
    %c0_14 = arith.constant 0 : index
    %20 = vector.load %arg5[%c2, %c0_14] : memref<8x384xf32, #tpu.memory_space<vmem>>, vector<1x128xf32>
    %21 = vector.broadcast %20 : vector<1x128xf32> to vector<8x128xf32>
    %22 = arith.addf %19, %21 : vector<8x128xf32>
    %cst_15 = arith.constant 0.000000e+00 : f32
    %23 = vector.broadcast %cst_15 : f32 to vector<8x128xf32>
    %24 = arith.maximumf %22, %23 : vector<8x128xf32>
    %c0_16 = arith.constant 0 : index
    %c0_17 = arith.constant 0 : index
    %25 = vector.load %arg4[%c0_16, %c0_17] : memref<384x128xbf16, #tpu.memory_space<vmem>>, vector<128x128xbf16>
    %26 = arith.truncf %24 : vector<8x128xf32> to vector<8x128xbf16>
    %cst_18 = arith.constant dense<0.000000e+00> : vector<8x128xf32>
    %27 = tpu.matmul %26, %25, %cst_18 {dimension_numbers = #tpu.dot_dimension_numbers<[1], [0], [0], [1], [0, 0, 1, 1], [], []>} : vector<8x128xbf16>, vector<128x128xbf16>, vector<8x128xf32> -> vector<8x128xf32>
    %c3 = arith.constant 3 : index
    %c0_19 = arith.constant 0 : index
    %28 = vector.load %arg5[%c3, %c0_19] : memref<8x384xf32, #tpu.memory_space<vmem>>, vector<1x128xf32>
    %29 = vector.broadcast %28 : vector<1x128xf32> to vector<8x128xf32>
    %30 = arith.addf %27, %29 : vector<8x128xf32>
    %cst_20 = arith.constant 0.000000e+00 : f32
    %31 = vector.broadcast %cst_20 : f32 to vector<8x128xf32>
    %32 = arith.maximumf %30, %31 : vector<8x128xf32>
    %c128 = arith.constant 128 : index
    %c0_21 = arith.constant 0 : index
    %33 = vector.load %arg4[%c128, %c0_21] : memref<384x128xbf16, #tpu.memory_space<vmem>>, vector<128x128xbf16>
    %34 = arith.truncf %32 : vector<8x128xf32> to vector<8x128xbf16>
    %cst_22 = arith.constant dense<0.000000e+00> : vector<8x128xf32>
    %35 = tpu.matmul %34, %33, %cst_22 {dimension_numbers = #tpu.dot_dimension_numbers<[1], [0], [0], [1], [0, 0, 1, 1], [], []>} : vector<8x128xbf16>, vector<128x128xbf16>, vector<8x128xf32> -> vector<8x128xf32>
    %c4 = arith.constant 4 : index
    %c0_23 = arith.constant 0 : index
    %36 = vector.load %arg5[%c4, %c0_23] : memref<8x384xf32, #tpu.memory_space<vmem>>, vector<1x128xf32>
    %37 = vector.broadcast %36 : vector<1x128xf32> to vector<8x128xf32>
    %38 = arith.addf %35, %37 : vector<8x128xf32>
    %cst_24 = arith.constant 0.000000e+00 : f32
    %39 = vector.broadcast %cst_24 : f32 to vector<8x128xf32>
    %40 = arith.maximumf %38, %39 : vector<8x128xf32>
    %c256 = arith.constant 256 : index
    %c0_25 = arith.constant 0 : index
    %41 = vector.load %arg4[%c256, %c0_25] : memref<384x128xbf16, #tpu.memory_space<vmem>>, vector<128x128xbf16>
    %42 = arith.truncf %40 : vector<8x128xf32> to vector<8x128xbf16>
    %cst_26 = arith.constant dense<0.000000e+00> : vector<8x128xf32>
    %43 = tpu.matmul %42, %41, %cst_26 {dimension_numbers = #tpu.dot_dimension_numbers<[1], [0], [0], [1], [0, 0, 1, 1], [], []>} : vector<8x128xbf16>, vector<128x128xbf16>, vector<8x128xf32> -> vector<8x128xf32>
    %c5 = arith.constant 5 : index
    %c0_27 = arith.constant 0 : index
    %44 = vector.load %arg5[%c5, %c0_27] : memref<8x384xf32, #tpu.memory_space<vmem>>, vector<1x128xf32>
    %45 = vector.broadcast %44 : vector<1x128xf32> to vector<8x128xf32>
    %46 = arith.addf %43, %45 : vector<8x128xf32>
    %47 = arith.negf %46 : vector<8x128xf32>
    %48 = math.exp %47 : vector<8x128xf32>
    %cst_28 = arith.constant 1.000000e+00 : f32
    %49 = vector.broadcast %cst_28 : f32 to vector<8x128xf32>
    %50 = arith.addf %49, %48 : vector<8x128xf32>
    %51 = arith.divf %49, %50 : vector<8x128xf32>
    %c0_29 = arith.constant 0 : index
    %c0_30 = arith.constant 0 : index
    %52 = vector.load %arg6[%c0_29, %c0_30] : memref<8x128xf32, #tpu.memory_space<vmem>>, vector<8x128xf32>
    tpu.vector_store %arg6[%c0_29, %c0_30], %51 {strides = array<i32>} : memref<8x128xf32, #tpu.memory_space<vmem>>, vector<8x128xf32>,
    return
  }
}

</mosaic_0001>

<bundles_post_ra>
// kernel: cnn_mlp_forward.1
= control target key start
LH: loop header
LB: loop body
LE: loop exit
PB: predicated region body
PF: predicated region fallthrough
CT: control target
= control target key end

     0   :  { %11 = vsyncpa [#allocation3], 0  ;;  %s1847_s0 = inlined_call_operand.vmem [shape: f32[8,16], index: 0, kind: input, shape index: {}]   ;;  %s1848_s1 = inlined_call_operand.hbm [shape: bf16[16,256], index: 1, kind: input, shape index: {}]   ;;  %s1849_s2 = inlined_call_operand.hbm [shape: bf16[256,384], index: 2, kind: input, shape index: {}]   ;;  %s1850_s3 = inlined_call_operand.hbm [shape: bf16[384,128], index: 3, kind: input, shape index: {}]   ;;  %s1851_s4 = inlined_call_operand.hbm [shape: bf16[384,128], index: 4, kind: input, shape index: {}]   ;;  %s1852_s5 = inlined_call_operand.vmem [shape: f32[8,384], index: 5, kind: input, shape index: {}]   ;;  %s1853_s6 = inlined_call_operand.vmem [shape: f32[8,128], index: 6, kind: output, shape index: {}]  }
   0x1   :  { %12 = vsyncpa [#allocation5], 0 }
   0x2   :  { %13 = vsyncpa [#allocation8], 0  ;;  %s1674_s21 = smov [#allocation4]   ;;  %s1580_s25 = scalar_lea.hbm %s1849_s2, 6144 }
   0x3   :  { %s33_s22 = sshll.u32 %s1674_s21, 4  ;;  %p1581_p0 = scmp.ne.s32.totalorder %s1849_s2, %s1580_s25  ;;  %s34_s22 = int_to_ptr.vmem [resolvable:$true] %s33_s22 }
   0x4   :  { %p1584_p1 = scmp.lt.u32.totalorder %s1580_s25, %s1849_s2 }
   0x6   :  { %p1586_p2 = pnand %p1584_p1, %p1581_p0 }
   0x8   :  { %1589 = shalt.err (!%p1586_p2)
}
   0x9   :  { %s1590_s30 = scalar_lea.vmem %s34_s22, 6144  ;;  %p1595_p4 = scmp.lt.s32.totalorder %s34_s22, %s34_s22 }
   0xa   :  { %p1591_p3 = scmp.ne.s32.totalorder %s34_s22, %s1590_s30  ;;  %p1596_p5 = scmp.lt.s32.totalorder %s1590_s30, %s1590_s30 }
   0xc   :  { %p1597_p6 = por %p1596_p5, %p1595_p4 }
   0xe   :  { %p1598_p7 = pnand %p1597_p6, %p1591_p3 }
  0x10   :  { %1601 = shalt.err (!%p1598_p7)
}
  0x11   :  { %s1675_s7 = smov 192   ;;  %s1676_s8 = smov 12  }
  0x12   :  { %39 = dma.hbm_to_vmem [thread:$0]  %s1849_s2, 6144, %s34_s22, [#allocation5], %s1675_s7, %s1675_s7, %s1676_s8  }
  0x13   :  { %s1677_s11 = smov [#allocation2]   ;;  %s1602_s15 = scalar_lea.hbm %s1848_s1, 256 }
  0x14   :  { %s21_s12 = sshll.u32 %s1677_s11, 4  ;;  %p1603_p8 = scmp.ne.s32.totalorder %s1848_s1, %s1602_s15  ;;  %s22_s12 = int_to_ptr.vmem [resolvable:$true] %s21_s12 }
  0x15   :  { %p1606_p9 = scmp.lt.u32.totalorder %s1602_s15, %s1848_s1 }
  0x17   :  { %p1608_p10 = pnand %p1606_p9, %p1603_p8 }
  0x19   :  { %1611 = shalt.err (!%p1608_p10)
}
  0x1a   :  { %s1612_s20 = scalar_lea.vmem %s22_s12, 256  ;;  %p1617_p12 = scmp.lt.s32.totalorder %s22_s12, %s22_s12 }
  0x1b   :  { %p1613_p11 = scmp.ne.s32.totalorder %s22_s12, %s1612_s20  ;;  %p1618_p13 = scmp.lt.s32.totalorder %s1612_s20, %s1612_s20 }
  0x1d   :  { %p1619_p0 = por %p1618_p13, %p1617_p12 }
  0x1f   :  { %p1620_p1 = pnand %p1619_p0, %p1613_p11 }
  0x21   :  { %1623 = shalt.err (!%p1620_p1)
}
  0x22   :  { %s1678_s2 = smov 128   ;;  %s1679_s21 = smov 8  }
  0x23   :  { %27 = dma.hbm_to_vmem [thread:$0]  %s1848_s1, 256, %s22_s12, [#allocation3], %s1678_s2, %s1678_s2, %s1679_s21  }
  0x24   :  { %s1680_s24 = smov [#allocation6]   ;;  %s1624_s28 = scalar_lea.hbm %s1850_s3, 3072 }
  0x25   :  { %s45_s25 = sshll.u32 %s1680_s24, 4  ;;  %p1625_p2 = scmp.ne.s32.totalorder %s1850_s3, %s1624_s28  ;;  %s46_s25 = int_to_ptr.vmem [resolvable:$true] %s45_s25 }
  0x26   :  { %p1628_p3 = scmp.lt.u32.totalorder %s1624_s28, %s1850_s3 }
  0x28   :  { %p1630_p4 = pnand %p1628_p3, %p1625_p2 }
  0x2a   :  { %1633 = shalt.err (!%p1630_p4)
}
  0x2b   :  { %s1634_s9 = scalar_lea.vmem %s46_s25, 3072  ;;  %p1639_p6 = scmp.lt.s32.totalorder %s46_s25, %s46_s25 }
  0x2c   :  { %p1635_p5 = scmp.ne.s32.totalorder %s46_s25, %s1634_s9  ;;  %p1640_p7 = scmp.lt.s32.totalorder %s1634_s9, %s1634_s9 }
  0x2e   :  { %p1641_p8 = por %p1640_p7, %p1639_p6 }
  0x30   :  { %p1642_p9 = pnand %p1641_p8, %p1635_p5 }
  0x32   :  { %1645 = shalt.err (!%p1642_p9)
}
  0x33   :  { %s1681_s1 = smov 64   ;;  %s1682_s10 = smov 4  }
  0x34   :  { %51 = dma.hbm_to_vmem [thread:$0]  %s1850_s3, 3072, %s46_s25, [#allocation5], %s1681_s1, %s1681_s1, %s1682_s10  }
  0x35   :  { %s1683_s13 = smov [#allocation7]   ;;  %s1646_s17 = scalar_lea.hbm %s1851_s4, 3072 }
  0x36   :  { %s57_s14 = sshll.u32 %s1683_s13, 4  ;;  %p1647_p10 = scmp.ne.s32.totalorder %s1851_s4, %s1646_s17  ;;  %s58_s14 = int_to_ptr.vmem [resolvable:$true] %s57_s14 }
  0x37   :  { %p1650_p11 = scmp.lt.u32.totalorder %s1646_s17, %s1851_s4 }
  0x39   :  { %p1652_p12 = pnand %p1650_p11, %p1647_p10 }
  0x3b   :  { %1655 = shalt.err (!%p1652_p12)
}
  0x3c   :  { %s1656_s21 = scalar_lea.vmem %s58_s14, 3072  ;;  %p1661_p0 = scmp.lt.s32.totalorder %s58_s14, %s58_s14 }
  0x3d   :  { %p1657_p13 = scmp.ne.s32.totalorder %s58_s14, %s1656_s21  ;;  %p1662_p1 = scmp.lt.s32.totalorder %s1656_s21, %s1656_s21 }
  0x3f   :  { %p1663_p2 = por %p1662_p1, %p1661_p0 }
  0x41   :  { %p1664_p3 = pnand %p1663_p2, %p1657_p13 }
  0x43   :  { %1667 = shalt.err (!%p1664_p3)
}
  0x44   :  { %63 = dma.hbm_to_vmem [thread:$0]  %s1851_s4, 3072, %s58_s14, [#allocation8], %s1681_s1, %s1681_s1, %s1682_s10  }
  0x45   :  { %1668 = dma.done.wait [#allocation3], 256  }
  0x46   :  { %1669 = vsyncadd [#allocation3], 4294967040 }
  0x47   :  { %1670 = dma.done.wait [#allocation5], 9216  }
  0x48   :  { %1671 = vsyncadd [#allocation5], 4294958080 }
  0x49   :  { %1672 = dma.done.wait [#allocation8], 3072  }
  0x4a   :  { %1673 = vsyncadd [#allocation8], 4294964224  ;;  %v1684_v0 = vmov 0   ;;  %v1461_v1 = vld [vmem:[#allocation2 + $0x4] ss:$8 sps:$4 sm:$0xff]   ;;  %vm105_vm0 = vcmask 130048   ;;  %v85_v55 = vlaneseq }
  0x4b   :  { %141 = vmatprep.mubr.bf16.mxu0 %v1684_v0  ;;  %v1463_v2 = vld [vmem:[#allocation2] ss:$8 sps:$4 sm:$0xff]   ;;  %109 = vmatprep.subr.bf16.mxu0 %v1461_v1  ;;  %v1466_v6 = vld [vmem:[#allocation4] ss:$12 sps:$4 sm:$0xff]   ;;  %v1467_v7 = vld [vmem:[#allocation4 + $0x1c] ss:$12 sps:$4 sm:$0xff]  }
  0x4c   :  { %v79_v3 = vld [vmem:[%s1847_s0] sm:$0xff]  ;;  %v1464_v5 = vld [vmem:[#allocation4 + $0x4] ss:$12 sps:$4 sm:$0xff]   ;;  %110 = vmatpush1.bf16.msra.mxu0 %v1463_v2  ;;  %v1470_v9 = vld [vmem:[#allocation4 + $0x34] ss:$12 sps:$4 sm:$0xff]   ;;  %v1685_v54 = vmov 0.0  }
  0x4d   :  { %v82_v4 = vpack.c.bf16 %v79_v3, %v79_v3  ;;  %492 = vmatprep.subr.bf16.mxu1 %v1464_v5  ;;  %v1469_v8 = vld [vmem:[#allocation4 + $0x18] ss:$12 sps:$4 sm:$0xff]   ;;  %v1472_v10 = vld [vmem:[#allocation4 + $0x30] ss:$12 sps:$4 sm:$0xff]   ;;  %v1475_v12 = vld [vmem:[#allocation4 + $0x48] ss:$12 sps:$4 sm:$0xff]  }
  0x4e   :  { %493 = vmatpush1.bf16.msra.mxu1 %v1466_v6  ;;  %v1473_v11 = vld [vmem:[#allocation4 + $0x4c] ss:$12 sps:$4 sm:$0xff]   ;;  %v1476_v13 = vld [vmem:[#allocation4 + $0x64] ss:$12 sps:$4 sm:$0xff]   ;;  %v1490_v14 = vld [vmem:[#allocation4 + $0xc8] ss:$12 sps:$4 sm:$0xff]  }
  0x4f   :  { %1189 = vmatmul.mubr.msk.bf16.vlgmr.msra.gmra.mrb[0].mxu0 %vm105_vm0, %v82_v4  ;;  %494 = vmatprep.subr.bf16.mxu1 %v1467_v7  ;;  %v1492_v15 = vld [vmem:[#allocation4 + $0x8] ss:$12 sps:$4 sm:$0xff]   ;;  %v1478_v16 = vld [vmem:[#allocation4 + $0x60] ss:$12 sps:$4 sm:$0xff]   ;;  %v1481_v20 = vld [vmem:[#allocation4 + $0x78] ss:$12 sps:$4 sm:$0xff]  }
  0x50   :  { %1288 = vmatprep.subr.bf16.mxu0 %v1490_v14  ;;  %v1479_v17 = vld [vmem:[#allocation4 + $0x7c] ss:$12 sps:$4 sm:$0xff]   ;;  %v1495_v18 = vld [vmem:[#allocation4 + $0xe0] ss:$12 sps:$4 sm:$0xff]   ;;  %v1500_v21 = vld [vmem:[#allocation4 + $0xf8] ss:$12 sps:$4 sm:$0xff]  }
  0x51   :  { %1289 = vmatpush3.bf16.msra.mxu0 %v1492_v15  ;;  %v1497_v19 = vld [vmem:[#allocation4 + $0x20] ss:$12 sps:$4 sm:$0xff]   ;;  %v1502_v23 = vld [vmem:[#allocation4 + $0x38] ss:$12 sps:$4 sm:$0xff]   ;;  %v1484_v24 = vld [vmem:[#allocation4 + $0x90] ss:$12 sps:$4 sm:$0xff]  }
  0x52   :  { %495 = vmatpush1.bf16.msra.mxu1 %v1469_v8  ;;  %1290 = vmatprep.subr.bf16.mxu0 %v1495_v18  ;;  %v1482_v22 = vld [vmem:[#allocation4 + $0x94] ss:$12 sps:$4 sm:$0xff]   ;;  %v1505_v25 = vld [vmem:[#allocation4 + $0x110] ss:$12 sps:$4 sm:$0xff]   ;;  %v1485_v27 = vld [vmem:[#allocation4 + $0xac] ss:$12 sps:$4 sm:$0xff]  }
  0x53   :  { %496 = vmatprep.subr.bf16.mxu1 %v1470_v9  ;;  %v1507_v26 = vld [vmem:[#allocation4 + $0x50] ss:$12 sps:$4 sm:$0xff]   ;;  %v1487_v28 = vld [vmem:[#allocation4 + $0xa8] ss:$12 sps:$4 sm:$0xff]   ;;  %v1515_v32 = vld [vmem:[#allocation4 + $0x140] ss:$12 sps:$4 sm:$0xff]  }
  0x54   :  { %v1510_v29 = vld [vmem:[#allocation4 + $0x128] ss:$12 sps:$4 sm:$0xff]   ;;  %v1488_v30 = vld [vmem:[#allocation4 + $0xc4] ss:$12 sps:$4 sm:$0xff]   ;;  %v1491_v33 = vld [vmem:[#allocation4 + $0xc0] ss:$12 sps:$4 sm:$0xff]  }
  0x55   :  { %1291 = vmatpush3.bf16.msra.mxu0 %v1497_v19  ;;  %v1512_v31 = vld [vmem:[#allocation4 + $0x68] ss:$12 sps:$4 sm:$0xff]   ;;  %v1517_v35 = vld [vmem:[#allocation4 + $0x80] ss:$12 sps:$4 sm:$0xff]   ;;  %v1496_v36 = vld [vmem:[#allocation4 + $0xd8] ss:$12 sps:$4 sm:$0xff]  }
  0x56   :  { %497 = vmatpush1.bf16.msra.mxu1 %v1472_v10  ;;  %1292 = vmatprep.subr.bf16.mxu0 %v1500_v21  ;;  %v1493_v34 = vld [vmem:[#allocation4 + $0xdc] ss:$12 sps:$4 sm:$0xff]   ;;  %v1498_v37 = vld [vmem:[#allocation4 + $0xf4] ss:$12 sps:$4 sm:$0xff]   ;;  %v1503_v39 = vld [vmem:[#allocation4 + $0x10c] ss:$12 sps:$4 sm:$0xff]  }
  0x57   :  { %498 = vmatprep.subr.bf16.mxu1 %v1473_v11  ;;  %v1501_v38 = vld [vmem:[#allocation4 + $0xf0] ss:$12 sps:$4 sm:$0xff]   ;;  %v1506_v40 = vld [vmem:[#allocation4 + $0x108] ss:$12 sps:$4 sm:$0xff]   ;;  %v1511_v42 = vld [vmem:[#allocation4 + $0x120] ss:$12 sps:$4 sm:$0xff]  }
  0x58   :  { %v1508_v41 = vld [vmem:[#allocation4 + $0x124] ss:$12 sps:$4 sm:$0xff]   ;;  %v1513_v43 = vld [vmem:[#allocation4 + $0x13c] ss:$12 sps:$4 sm:$0xff]   ;;  %v1518_v45 = vld [vmem:[#allocation4 + $0x154] ss:$12 sps:$4 sm:$0xff]  }
  0x59   :  { %1293 = vmatpush3.bf16.msra.mxu0 %v1502_v23  ;;  %v1516_v44 = vld [vmem:[#allocation4 + $0x138] ss:$12 sps:$4 sm:$0xff]   ;;  %v1521_v47 = vld [vmem:[#allocation4 + $0x150] ss:$12 sps:$4 sm:$0xff]   ;;  %v1526_v51 = vld [vmem:[#allocation4 + $0x168] ss:$12 sps:$4 sm:$0xff]  }
  0x5a   :  { %499 = vmatpush1.bf16.msra.mxu1 %v1475_v12  ;;  %1294 = vmatprep.subr.bf16.mxu0 %v1505_v25  ;;  %v1520_v46 = vld [vmem:[#allocation4 + $0x158] ss:$12 sps:$4 sm:$0xff]   ;;  %v1525_v50 = vld [vmem:[#allocation4 + $0x170] ss:$12 sps:$4 sm:$0xff]   ;;  %v1774_v56 = vshrl.u32 %v85_v55, 7  ;;  %v1531_v10 = vld [vmem:[#allocation6 + $0x48] sm:$0xff]  }
  0x5b   :  { %500 = vmatprep.subr.bf16.mxu1 %v1476_v13  ;;  %v1522_v48 = vld [vmem:[#allocation4 + $0x98] ss:$12 sps:$4 sm:$0xff]   ;;  %v1527_v52 = vld [vmem:[#allocation4 + $0xb0] ss:$12 sps:$4 sm:$0xff]   ;;  %v1532_v11 = vld [vmem:[#allocation6 + $0x8] sm:$0xff]   ;;  %vm1686_vm1 = vmmov 0  }
  0x5c   :  { %v1523_v49 = vld [vmem:[#allocation4 + $0x16c] ss:$12 sps:$4 sm:$0xff]   ;;  %v1528_v53 = vld [vmem:[#allocation6 + $0x40] sm:$0xff]   ;;  %v87_v57 = vsub.s32 0, %v1774_v56  ;;  %v91_v59 = vsub.s32 1, %v1774_v56  ;;  %v1534_v13 = vld [vmem:[#allocation6 + $0x50] sm:$0xff]  }
  0x5d   :  { %1295 = vmatpush3.bf16.msra.mxu0 %v1507_v26  ;;  %v83_v58 = vld [vmem:[%s1852_s5] ss:$8 sm:$0x3]  ;;  %v1533_v12 = vld [vmem:[#allocation6 + $0x88] sm:$0xff]   ;;  %v1535_v14 = vld [vmem:[#allocation6 + $0x10] sm:$0xff]  }
  0x5e   :  { %501 = vmatpush1.bf16.msra.mxu1 %v1478_v16  ;;  %1296 = vmatprep.subr.bf16.mxu0 %v1510_v29  ;;  %v88_v60 = vrot.slane %v83_v58, %v87_v57  ;;  %v92_v61 = vrot.slane %v83_v58, %v91_v59  ;;  %v1529_v7 = vld [vmem:[#allocation6] sm:$0xff]   ;;  %v1536_v15 = vld [vmem:[#allocation6 + $0x90] sm:$0xff]   ;;  %v1537_v16 = vld [vmem:[#allocation6 + $0x58] sm:$0xff]  }
  0x5f   :  { %502 = vmatprep.subr.bf16.mxu1 %v1479_v17  ;;  %v1530_v8 = vld [vmem:[#allocation6 + $0x80] sm:$0xff]   ;;  %v1538_v17 = vld [vmem:[#allocation6 + $0x18] sm:$0xff]   ;;  %v1544_v23 = vld [vmem:[#allocation6 + $0x28] sm:$0xff]  }
  0x60   :  { %v1539_v18 = vld [vmem:[#allocation6 + $0x98] sm:$0xff]   ;;  %v1540_v19 = vld [vmem:[#allocation6 + $0x60] sm:$0xff]   ;;  %v1546_v25 = vld [vmem:[#allocation6 + $0x70] sm:$0xff]  }
  0x61   :  { %1297 = vmatpush3.bf16.msra.mxu0 %v1512_v31  ;;  %v1542_v21 = vld [vmem:[#allocation6 + $0xa0] sm:$0xff]   ;;  %v1547_v26 = vld [vmem:[#allocation6 + $0x30] sm:$0xff]   ;;  %v1550_v29 = vld [vmem:[#allocation6 + $0x38] sm:$0xff]  }
  0x62   :  { %503 = vmatpush1.bf16.msra.mxu1 %v1481_v20  ;;  %1298 = vmatprep.subr.bf16.mxu0 %v1515_v32  ;;  %v1541_v20 = vld [vmem:[#allocation6 + $0x20] sm:$0xff]   ;;  %v231_v32 = vsub.s32 2, %v1774_v56  ;;  %v1553_v56 = vld [vmem:[#allocation7 + $0x8] sm:$0xff]   ;;  %v1555_v58 = vld [vmem:[#allocation7 + $0x18] sm:$0xff]  }
  0x63   :  { %504 = vmatprep.subr.bf16.mxu1 %v1482_v22  ;;  %v1543_v22 = vld [vmem:[#allocation6 + $0x68] sm:$0xff]  }
  0x64   :  { %v1190_v31 = vld [vmem:[%s1852_s5 + $0x1] ss:$8 sm:$0x7] }
  0x65   :  { %1299 = vmatpush3.bf16.msra.mxu0 %v1517_v35 }
  0x66   :  { %505 = vmatpush1.bf16.msra.mxu1 %v1484_v24  ;;  %1300 = vmatprep.subr.bf16.mxu0 %v1520_v46  ;;  %v1545_v24 = vld [vmem:[#allocation6 + $0xa8] sm:$0xff]  }
  0x67   :  { %506 = vmatprep.subr.bf16.mxu1 %v1485_v27  ;;  %v1548_v27 = vld [vmem:[#allocation6 + $0xb0] sm:$0xff]  }
  0x69   :  { %1301 = vmatpush3.bf16.msra.mxu0 %v1522_v48 }
  0x6a   :  { %507 = vmatpush1.bf16.msra.mxu1 %v1487_v28  ;;  %1302 = vmatprep.subr.bf16.mxu0 %v1525_v50  ;;  %v1549_v28 = vld [vmem:[#allocation6 + $0x78] sm:$0xff]  }
  0x6b   :  { %508 = vmatprep.subr.bf16.mxu1 %v1488_v30  ;;  %v1551_v30 = vld [vmem:[#allocation6 + $0xb8] sm:$0xff]  }
  0x6d   :  { %1303 = vmatpush3.bf16.msra.mxu0 %v1527_v52  ;;  %v1552_v52 = vld [vmem:[#allocation7] sm:$0xff]  }
  0x6e   :  { %509 = vmatpush1.bf16.msra.mxu1 %v1491_v33  ;;  %1310 = vmatprep.subr.bf16.mxu0 %v1528_v53  ;;  %v224_v33 = vrot.slane %v1190_v31, %v87_v57  ;;  %v1554_v57 = vld [vmem:[#allocation7 + $0x10] sm:$0xff]  }
  0x6f   :  { %510 = vmatprep.subr.bf16.mxu1 %v1493_v34  ;;  %v228_v34 = vrot.slane %v1190_v31, %v91_v59  ;;  %v1556_v59 = vld [vmem:[#allocation7 + $0x20] sm:$0xff]  }
  0x72   :  { %511 = vmatpush1.bf16.msra.mxu1 %v1496_v36 }
  0x73   :  { %512 = vmatprep.subr.bf16.mxu1 %v1498_v37  ;;  %v232_v37 = vrot.slane %v1190_v31, %v231_v32 }
  0x76   :  { %513 = vmatpush1.bf16.msra.mxu1 %v1501_v38 }
  0x77   :  { %514 = vmatprep.subr.bf16.mxu1 %v1503_v39 }
  0x7a   :  { %515 = vmatpush1.bf16.msra.mxu1 %v1506_v40 }
  0x7b   :  { %516 = vmatprep.subr.bf16.mxu1 %v1508_v41 }
  0x7e   :  { %517 = vmatpush1.bf16.msra.mxu1 %v1511_v42 }
  0x7f   :  { %518 = vmatprep.subr.bf16.mxu1 %v1513_v43 }
  0x82   :  { %519 = vmatpush1.bf16.msra.mxu1 %v1516_v44 }
  0x83   :  { %520 = vmatprep.subr.bf16.mxu1 %v1518_v45 }
  0x86   :  { %521 = vmatpush1.bf16.msra.mxu1 %v1521_v47 }
  0x87   :  { %522 = vmatprep.subr.bf16.mxu1 %v1523_v49 }
  0x8a   :  { %523 = vmatpush1.bf16.msra.mxu1 %v1526_v51 }
  0x8b   :  { %1368 = vmatprep.subr.bf16.mxu1 %v1685_v54 }
 0x122   :  { %v143_v62 = vpop.f32.mrb[0].mxu0 }
 0x123   :  { %v144_v63 = vadd.f32 %v143_v62, %v88_v60  ;;  %v145_v0 = vpop.f32.mrb[1].mxu0  ;;  %v1557_v60 = vld [vmem:[#allocation7 + $0x28] sm:$0xff]   ;;  %v1559_v62 = vld [vmem:[#allocation7 + $0x38] sm:$0xff]  }
 0x124   :  { %v146_v1 = vadd.f32 %v145_v0, %v92_v61  ;;  %v147_v2 = vpop.f32.mrb[2].mxu0  ;;  %v1558_v61 = vld [vmem:[#allocation7 + $0x30] sm:$0xff]   ;;  %v1561_v0 = vld [vmem:[#allocation7 + $0x48] sm:$0xff]  }
 0x125   :  { %v150_v3 = vmax.f32 %v144_v63, 0.0  ;;  %v148_v4 = vpop.f32.mrb[3].mxu0  ;;  %v1560_v63 = vld [vmem:[#allocation7 + $0x40] sm:$0xff]   ;;  %v1563_v2 = vld [vmem:[#allocation7 + $0x58] sm:$0xff]  }
 0x126   :  { %v151_v5 = vmax.f32 %v146_v1, 0.0  ;;  %v1562_v1 = vld [vmem:[#allocation7 + $0x50] sm:$0xff]   ;;  %v1565_v4 = vld [vmem:[#allocation7 + $0x68] sm:$0xff]  }
 0x127   :  { %v216_v9 = vpack.c.bf16 %v150_v3, %v150_v3  ;;  %v1564_v3 = vld [vmem:[#allocation7 + $0x60] sm:$0xff]  }
 0x128   :  { %v217_v6 = vpack.c.bf16 %v151_v5, %v151_v5 }
 0x12a   :  { %524 = vmatprep.mubr.bf16.mxu1 %v217_v6  ;;  %565 = vmatprep.mubr.bf16.mxu0 %v217_v6 }
 0x12b   :  { %525 = vmatmul.mubr.bf16.vlgmr.msra.gmra.mrb[0].mxu1 %v216_v9  ;;  %566 = vmatmul.mubr.bf16.vlgmr.msra.gmra.mrb[4].mxu0 %v216_v9 }
 0x12c   :  { %1311 = vmatpush3.bf16.msra.mxu0 %v1529_v7  ;;  %1369 = vmatpush3.bf16.msra.mxu1 %v1530_v8  ;;  %v627_v7 = vld [vmem:[%s1852_s5 + $0x2] ss:$0 sm:$0xff] }
 0x12d   :  { %1312 = vmatprep.subr.bf16.mxu0 %v1531_v10  ;;  %1370 = vmatprep.subr.bf16.mxu1 %v1685_v54 }
 0x12e   :  { %1384 = vmatprep.mubr.msk.bf16.mxu1 %vm1686_vm1, %v1685_v54 }
 0x130   :  { %1313 = vmatpush3.bf16.msra.mxu0 %v1532_v11  ;;  %1371 = vmatpush3.bf16.msra.mxu1 %v1533_v12 }
 0x131   :  { %1314 = vmatprep.subr.bf16.mxu0 %v1534_v13  ;;  %1372 = vmatprep.subr.bf16.mxu1 %v1685_v54 }
 0x134   :  { %1315 = vmatpush3.bf16.msra.mxu0 %v1535_v14  ;;  %1373 = vmatpush3.bf16.msra.mxu1 %v1536_v15 }
 0x135   :  { %1316 = vmatprep.subr.bf16.mxu0 %v1537_v16  ;;  %1374 = vmatprep.subr.bf16.mxu1 %v1685_v54 }
 0x138   :  { %1317 = vmatpush3.bf16.msra.mxu0 %v1538_v17  ;;  %1375 = vmatpush3.bf16.msra.mxu1 %v1539_v18 }
 0x139   :  { %1318 = vmatprep.subr.bf16.mxu0 %v1540_v19  ;;  %1376 = vmatprep.subr.bf16.mxu1 %v1685_v54  ;;  %v1566_v19 = vld [vmem:[#allocation7 + $0x70] sm:$0xff]  }
 0x13c   :  { %1319 = vmatpush3.bf16.msra.mxu0 %v1541_v20  ;;  %1377 = vmatpush3.bf16.msra.mxu1 %v1542_v21  ;;  %v1567_v20 = vld [vmem:[#allocation7 + $0x78] sm:$0xff]   ;;  %v1568_v21 = vld [vmem:[#allocation7 + $0x80] sm:$0xff]  }
 0x13d   :  { %1320 = vmatprep.subr.bf16.mxu0 %v1543_v22  ;;  %1378 = vmatprep.subr.bf16.mxu1 %v1685_v54  ;;  %v1569_v22 = vld [vmem:[#allocation7 + $0x88] sm:$0xff]  }
 0x140   :  { %1321 = vmatpush3.bf16.msra.mxu0 %v1544_v23  ;;  %1379 = vmatpush3.bf16.msra.mxu1 %v1545_v24  ;;  %v1570_v23 = vld [vmem:[#allocation7 + $0x90] sm:$0xff]   ;;  %v1571_v24 = vld [vmem:[#allocation7 + $0x98] sm:$0xff]  }
 0x141   :  { %1380 = vmatprep.subr.bf16.mxu1 %v1685_v54  ;;  %1322 = vmatprep.subr.bf16.mxu0 %v1546_v25  ;;  %v1572_v25 = vld [vmem:[#allocation7 + $0xa0] sm:$0xff]  }
 0x144   :  { %1323 = vmatpush3.bf16.msra.mxu0 %v1547_v26  ;;  %1381 = vmatpush3.bf16.msra.mxu1 %v1548_v27  ;;  %v1573_v26 = vld [vmem:[#allocation7 + $0xa8] sm:$0xff]   ;;  %v870_v27 = vld [vmem:[%s1852_s5 + $0x3] ss:$0 sm:$0xff] }
 0x145   :  { %1382 = vmatprep.subr.bf16.mxu1 %v1685_v54  ;;  %1324 = vmatprep.subr.bf16.mxu0 %v1549_v28 }
 0x148   :  { %1325 = vmatpush3.bf16.msra.mxu0 %v1550_v29  ;;  %1383 = vmatpush3.bf16.msra.mxu1 %v1551_v30 }
 0x149   :  { %1388 = vmatprep.subr.bf16.mxu0 %v1685_v54  ;;  %1408 = vmatprep.subr.bf16.mxu1 %v1685_v54 }
 0x1fe   :  { %v526_v35 = vpop.f32.mrb[0].mxu1  ;;  %v1304_v36 = vpop.f32.mrb[4].mxu0 }
 0x1ff   :  { %v527_v38 = vadd.f32 %v526_v35, %v224_v33  ;;  %v528_v39 = vpop.f32.mrb[1].mxu1  ;;  %v1305_v40 = vpop.f32.mrb[5].mxu0  ;;  %v1574_v35 = vld [vmem:[#allocation7 + $0xb0] sm:$0xff]  }
 0x200   :  { %v529_v41 = vadd.f32 %v528_v39, %v228_v34  ;;  %v1306_v42 = vadd.f32 %v1305_v40, %v1304_v36  ;;  %v530_v43 = vpop.f32.mrb[2].mxu1  ;;  %v1307_v44 = vpop.f32.mrb[6].mxu0  ;;  %v1575_v36 = vld [vmem:[#allocation7 + $0xb8] sm:$0xff]  }
 0x201   :  { %v573_v45 = vmax.f32 %v527_v38, 0.0  ;;  %v531_v46 = vpop.f32.mrb[3].mxu1  ;;  %v1308_v47 = vpop.f32.mrb[7].mxu0 }
 0x202   :  { %v574_v48 = vmax.f32 %v529_v41, 0.0  ;;  %v568_v49 = vadd.f32 %v1306_v42, %v232_v37  ;;  %v977_v37 = vld [vmem:[%s1852_s5 + $0x4] ss:$0 sm:$0xff] }
 0x203   :  { %v624_v53 = vpack.c.bf16 %v573_v45, %v573_v45  ;;  %v1084_v45 = vld [vmem:[%s1852_s5 + $0x5] ss:$0 sm:$0xff] }
 0x204   :  { %v625_v50 = vpack.c.bf16 %v574_v48, %v574_v48  ;;  %v575_v51 = vmax.f32 %v568_v49, 0.0 }
 0x206   :  { %v626_v55 = vpack.c.bf16 %v575_v51, %v575_v51  ;;  %804 = vmatprep.mubr.bf16.mxu0 %v625_v50 }
 0x207   :  { %805 = vmatmul.mubr.bf16.vlgmr.msra.gmra.mrb[8].mxu0 %v624_v53 }
 0x208   :  { %1385 = vmatmul.mubr.bf16.vlgmr.msra.gmra.mrb[4].mxu1 %v626_v55  ;;  %1389 = vmatpush3.bf16.msra.mxu0 %v1552_v52 }
 0x209   :  { %1390 = vmatprep.subr.bf16.mxu0 %v1685_v54  ;;  %1404 = vmatprep.mubr.msk.bf16.mxu0 %vm1686_vm1, %v1685_v54 }
 0x20a   :  { %1424 = vmatprep.mubr.msk.bf16.mxu1 %vm1686_vm1, %v1685_v54  ;;  %1409 = vmatpush3.bf16.msra.mxu1 %v1560_v63 }
 0x20b   :  { %1410 = vmatprep.subr.bf16.mxu1 %v1685_v54 }
 0x20c   :  { %1391 = vmatpush3.bf16.msra.mxu0 %v1553_v56 }
 0x20d   :  { %1392 = vmatprep.subr.bf16.mxu0 %v1685_v54 }
 0x20e   :  { %1411 = vmatpush3.bf16.msra.mxu1 %v1561_v0 }
 0x20f   :  { %1412 = vmatprep.subr.bf16.mxu1 %v1685_v54 }
 0x210   :  { %1393 = vmatpush3.bf16.msra.mxu0 %v1554_v57 }
 0x211   :  { %1394 = vmatprep.subr.bf16.mxu0 %v1685_v54 }
 0x212   :  { %1413 = vmatpush3.bf16.msra.mxu1 %v1562_v1 }
 0x213   :  { %1414 = vmatprep.subr.bf16.mxu1 %v1685_v54 }
 0x214   :  { %1395 = vmatpush3.bf16.msra.mxu0 %v1555_v58 }
 0x215   :  { %1396 = vmatprep.subr.bf16.mxu0 %v1685_v54 }
 0x216   :  { %1415 = vmatpush3.bf16.msra.mxu1 %v1563_v2 }
 0x217   :  { %1416 = vmatprep.subr.bf16.mxu1 %v1685_v54 }
 0x218   :  { %1397 = vmatpush3.bf16.msra.mxu0 %v1556_v59 }
 0x219   :  { %1398 = vmatprep.subr.bf16.mxu0 %v1685_v54 }
 0x21a   :  { %1417 = vmatpush3.bf16.msra.mxu1 %v1564_v3 }
 0x21b   :  { %1418 = vmatprep.subr.bf16.mxu1 %v1685_v54 }
 0x21c   :  { %1399 = vmatpush3.bf16.msra.mxu0 %v1557_v60 }
 0x21d   :  { %1400 = vmatprep.subr.bf16.mxu0 %v1685_v54 }
 0x21e   :  { %1419 = vmatpush3.bf16.msra.mxu1 %v1565_v4 }
 0x21f   :  { %1420 = vmatprep.subr.bf16.mxu1 %v1685_v54 }
 0x220   :  { %1401 = vmatpush3.bf16.msra.mxu0 %v1558_v61 }
 0x221   :  { %1402 = vmatprep.subr.bf16.mxu0 %v1685_v54 }
 0x222   :  { %1421 = vmatpush3.bf16.msra.mxu1 %v1566_v19 }
 0x223   :  { %1422 = vmatprep.subr.bf16.mxu1 %v1685_v54 }
 0x224   :  { %1403 = vmatpush3.bf16.msra.mxu0 %v1559_v62 }
 0x225   :  { %1428 = vmatprep.subr.bf16.mxu0 %v1685_v54 }
 0x226   :  { %1423 = vmatpush3.bf16.msra.mxu1 %v1567_v20 }
 0x2da   :  { %v1326_v5 = vpop.f32.mrb[8].mxu0 }
 0x2db   :  { %v1327_v6 = vpop.f32.mrb[9].mxu0  ;;  %v846_v8 = vpop.f32.mrb[4].mxu1 }
 0x2dc   :  { %v1328_v9 = vadd.f32 %v1327_v6, %v1326_v5  ;;  %v1329_v10 = vpop.f32.mrb[10].mxu0  ;;  %v1386_v11 = vpop.f32.mrb[5].mxu1 }
 0x2dd   :  { %v1330_v12 = vpop.f32.mrb[11].mxu0  ;;  %v849_v13 = vpop.f32.mrb[6].mxu1 }
 0x2de   :  { %v807_v14 = vadd.f32 %v1328_v9, %v627_v7  ;;  %v1387_v15 = vpop.f32.mrb[7].mxu1 }
 0x2e0   :  { %v847_v16 = vadd.f32 %v846_v8, %v807_v14 }
 0x2e2   :  { %v852_v17 = vmax.f32 %v847_v16, 0.0 }
 0x2e4   :  { %v869_v18 = vpack.c.bf16 %v852_v17, %v852_v17 }
 0x2e6   :  { %1405 = vmatmul.mubr.bf16.vlgmr.msra.gmra.mrb[12].mxu0 %v869_v18 }
 0x2e7   :  { %1444 = vmatprep.mubr.msk.bf16.mxu0 %vm1686_vm1, %v1685_v54  ;;  %1429 = vmatpush3.bf16.msra.mxu0 %v1568_v21 }
 0x2e8   :  { %1430 = vmatprep.subr.bf16.mxu0 %v1685_v54 }
 0x2eb   :  { %1431 = vmatpush3.bf16.msra.mxu0 %v1569_v22 }
 0x2ec   :  { %1432 = vmatprep.subr.bf16.mxu0 %v1685_v54 }
 0x2ef   :  { %1433 = vmatpush3.bf16.msra.mxu0 %v1570_v23 }
 0x2f0   :  { %1434 = vmatprep.subr.bf16.mxu0 %v1685_v54 }
 0x2f3   :  { %1435 = vmatpush3.bf16.msra.mxu0 %v1571_v24 }
 0x2f4   :  { %1436 = vmatprep.subr.bf16.mxu0 %v1685_v54 }
 0x2f7   :  { %1437 = vmatpush3.bf16.msra.mxu0 %v1572_v25 }
 0x2f8   :  { %1438 = vmatprep.subr.bf16.mxu0 %v1685_v54 }
 0x2fb   :  { %1439 = vmatpush3.bf16.msra.mxu0 %v1573_v26 }
 0x2fc   :  { %1440 = vmatprep.subr.bf16.mxu0 %v1685_v54 }
 0x2ff   :  { %1441 = vmatpush3.bf16.msra.mxu0 %v1574_v35 }
 0x300   :  { %1442 = vmatprep.subr.bf16.mxu0 %v1685_v54 }
 0x303   :  { %1443 = vmatpush3.bf16.msra.mxu0 %v1575_v36 }
 0x3b9   :  { %v953_v28 = vpop.f32.mrb[12].mxu0 }
 0x3ba   :  { %v954_v29 = vadd.f32 %v953_v28, %v870_v27  ;;  %v1406_v30 = vpop.f32.mrb[13].mxu0 }
 0x3bb   :  { %v956_v31 = vpop.f32.mrb[14].mxu0 }
 0x3bc   :  { %v959_v32 = vmax.f32 %v954_v29, 0.0  ;;  %v1407_v33 = vpop.f32.mrb[15].mxu0 }
 0x3be   :  { %v976_v34 = vpack.c.bf16 %v959_v32, %v959_v32 }
 0x3c0   :  { %1425 = vmatmul.mubr.bf16.vlgmr.msra.gmra.mrb[8].mxu1 %v976_v34 }
 0x493   :  { %v1060_v38 = vpop.f32.mrb[8].mxu1 }
 0x494   :  { %v1061_v39 = vadd.f32 %v1060_v38, %v977_v37  ;;  %v1426_v40 = vpop.f32.mrb[9].mxu1 }
 0x495   :  { %v1063_v41 = vpop.f32.mrb[10].mxu1 }
 0x496   :  { %v1066_v42 = vmax.f32 %v1061_v39, 0.0  ;;  %v1427_v43 = vpop.f32.mrb[11].mxu1 }
 0x498   :  { %v1083_v44 = vpack.c.bf16 %v1066_v42, %v1066_v42 }
 0x49a   :  { %1445 = vmatmul.mubr.bf16.vlgmr.msra.gmra.mrb[16].mxu0 %v1083_v44 }
 0x56d   :  { %v1167_v46 = vpop.f32.mrb[16].mxu0 }
 0x56e   :  { %v1168_v54 = vadd.f32 %v1167_v46, %v1084_v45  ;;  %v1446_v47 = vpop.f32.mrb[17].mxu0 }
 0x56f   :  { %v1170_v48 = vpop.f32.mrb[18].mxu0 }
 0x570   :  { %v1287_v49 = vmul.f32 -1.442695, %v1168_v54  ;;  %v1447_v50 = vpop.f32.mrb[19].mxu0 }
 0x572   :  { %1576 = vpow2.f32 %v1287_v49 }
 0x57c   :  { %v1577_v51 = vpop.eup %1576 }
 0x57d   :  { %v1176_v52 = vadd.f32 1.0, %v1577_v51 }
 0x57f   :  { %1578 = vrcp.f32 %v1176_v52 }
 0x589   :  { %v1579_v53 = vpop.eup %1578 }
 0x58a   :  { %1179 = vst [vmem:[%s1853_s6] sm:$0xff] %v1579_v53 }
 0x58b   :  { %1184 = vsyncpa [#allocation3], 1 }
 0x58c   :  { %1185 = vsyncpa [#allocation5], 1 }
 0x58d   :  { %1186 = vsyncpa [#allocation8], 1 }

</bundles_post_ra>
